<compile_context>
chip_gen: v5e
topology: v5e:2x2
jax: 0.10.0
libtpu: 0.0.40
codegen_flags: <defaults>
</compile_context>

<pallas_src>
import math

import jax
import jax.numpy as jnp
from jax import lax
from jax.experimental import pallas as pl
from jax.experimental.pallas import tpu as pltpu


def _round_up(n, m):
    return ((n + m - 1) // m) * m


def vessel_mlp_kernel(x_ref, w1_ref, b1_ref, w2_ref, b2_ref,
                      w3_ref, b3_ref, w4_ref, b4_ref, o_ref):
    """One batch tile of the MLP, computed in lane-dense (feature, batch) layout.

    x_ref : (TB, 10) f32  (natural input layout; transposed on the fly by dot_general)
    w1_ref: (30, 10)  bf16   b1_ref: (30, 1)  f32
    w2_ref: (100, 30) bf16   b2_ref: (100, 1) f32
    w3_ref: (50, 100) bf16   b3_ref: (50, 1)  f32
    w4_ref: (1, 50)   bf16   b4_ref: (1, 1)   f32
    o_ref : (1, TB)   f32
    """
    # Layer 1: contract x's feature axis (last) against w1's last axis -> (30, TB).
    x16 = x_ref[...].astype(jnp.bfloat16)
    h1 = jnp.maximum(
        lax.dot_general(w1_ref[...], x16,
                        dimension_numbers=(((1,), (1,)), ((), ())),
                        preferred_element_type=jnp.float32) + b1_ref[...], 0.0)
    # Layers 2 & 3: standard (out, in) @ (in, TB) bf16 MXU matmuls, f32 accumulation.
    h2 = jnp.maximum(
        jnp.dot(w2_ref[...], h1.astype(jnp.bfloat16),
                preferred_element_type=jnp.float32) + b2_ref[...], 0.0)
    h3 = jnp.maximum(
        jnp.dot(w3_ref[...], h2.astype(jnp.bfloat16),
                preferred_element_type=jnp.float32) + b3_ref[...], 0.0)
    # Final 50 -> 1 layer as an M=1 MXU dot (MXU has slack; keeps VALU/XLU free).
    o_ref[...] = jnp.dot(w4_ref[...], h3.astype(jnp.bfloat16),
                         preferred_element_type=jnp.float32) + b4_ref[...]


def _pick_tile(batch, tb):
    """Tile size: either TB == B (tiny batches, single step) or a multiple of 128,
    capped so large batches get >= 2 grid steps (v7x megacore sharding)."""
    if batch <= 256:
        return batch
    half = _round_up((batch + 1) // 2, 128)
    tile = min(tb, half)
    return max(128, (tile // 128) * 128)


def vessel_model_forward(x, params, *, tb=8192):
    """x: (B, 10) float32 -> (B, 1) float32.  Semantics of VesselModel.forward."""
    (w1, b1), (w2, b2), (w3, b3), (w4, b4) = params
    B = x.shape[0]

    # One-time (tiny) weight layout plumbing: transposed (out, in), bf16 for the MXU.
    w1t = w1.T.astype(jnp.bfloat16)            # (30, 10)
    w2t = w2.T.astype(jnp.bfloat16)            # (100, 30)
    w3t = w3.T.astype(jnp.bfloat16)            # (50, 100)
    w4r = w4.T.astype(jnp.bfloat16)            # (1, 50)
    b1c = b1.reshape(-1, 1)                    # (30, 1) f32
    b2c = b2.reshape(-1, 1)                    # (100, 1) f32
    b3c = b3.reshape(-1, 1)                    # (50, 1) f32
    b4c = b4.reshape(1, 1)                     # (1, 1) f32

    TB = _pick_tile(B, tb)
    grid = (pl.cdiv(B, TB),)

    # Weights/biases: constant index_map -> DMA'd once, VMEM-resident across the grid.
    resident = lambda a: pl.BlockSpec(a.shape, lambda i: (0, 0))

    cost = pl.CostEstimate(flops=2 * 8350 * B, transcendentals=0,
                           bytes_accessed=44 * B + 20_000)

    outT = pl.pallas_call(
        vessel_mlp_kernel,
        out_shape=jax.ShapeDtypeStruct((1, B), jnp.float32),
        grid_spec=pltpu.PrefetchScalarGridSpec(
            num_scalar_prefetch=0,
            grid=grid,
            in_specs=[pl.BlockSpec((TB, 10), lambda i: (i, 0)),  # x tile, pipelined
                      resident(w1t), resident(b1c),
                      resident(w2t), resident(b2c),
                      resident(w3t), resident(b3c),
                      resident(w4r), resident(b4c)],
            out_specs=pl.BlockSpec((1, TB), lambda i: (0, i)),
        ),
        compiler_params=pltpu.CompilerParams(
            dimension_semantics=("parallel",)),  # megacore sharding on v7x
        cost_estimate=cost,
    )(x, w1t, b1c, w2t, b2c, w3t, b3c, w4r, b4c)

    # (1, B) -> (B, 1): logically a reshape; negligible.
    return outT.T


def init_params(key):
    """Deterministic init mimicking PyTorch nn.Linear default (U[-1/sqrt(fan_in), +])."""
    sizes = [(10, 30), (30, 100), (100, 50), (50, 1)]
    params = []
    for fan_in, fan_out in sizes:
        key, kw, kb = jax.random.split(key, 3)
        bound = 1.0 / math.sqrt(fan_in)
        w = jax.random.uniform(kw, (fan_in, fan_out), jnp.float32, -bound, bound)
        b = jax.random.uniform(kb, (fan_out,), jnp.float32, -bound, bound)
        params.append((w, b))
    return params


def reference_forward(x, params):
    """Pure-JAX f32 reference for correctness checking."""
    (w1, b1), (w2, b2), (w3, b3), (w4, b4) = params
    h = jnp.maximum(x @ w1 + b1, 0.0)
    h = jnp.maximum(h @ w2 + b2, 0.0)
    h = jnp.maximum(h @ w3 + b3, 0.0)
    return h @ w4 + b4


if __name__ == "__main__":
    key = jax.random.PRNGKey(0)
    key, kx_small, kx_big = jax.random.split(key, 3)
    params = init_params(key)

    # Small batch: single grid step (TB == B), exercises the tiny-tile path.
    x_small = jax.random.normal(kx_small, (8, 10), dtype=jnp.float32)
    out_small = jax.block_until_ready(vessel_model_forward(x_small, params))
    ref_small = reference_forward(x_small, params)
    assert out_small.shape == (8, 1), out_small.shape
    # bf16 MXU operands (f32 accumulation) -> relaxed tolerance vs the f32 reference.
    assert jnp.allclose(out_small, ref_small, atol=2e-2, rtol=2e-2), "small-batch mismatch"

    # Larger, non-multiple-of-tile batch: >=2 pipelined grid steps + masked tail block.
    x_big = jax.random.normal(kx_big, (1000, 10), dtype=jnp.float32)
    out_big = jax.block_until_ready(vessel_model_forward(x_big, params))
    ref_big = reference_forward(x_big, params)
    assert out_big.shape == (1000, 1), out_big.shape
    assert jnp.allclose(out_big, ref_big, atol=2e-2, rtol=2e-2), "big-batch mismatch"

    print("KERNEL_OK")
</pallas_src>

<mosaic_0001>
module attributes {stable_mosaic.version = 11 : i64} {
  func.func @vessel_mlp_kernel(%arg0: i32, %arg1: memref<8x10xf32, #tpu.memory_space<vmem>>, %arg2: memref<30x10xbf16, #tpu.memory_space<vmem>>, %arg3: memref<30x1xf32, #tpu.memory_space<vmem>>, %arg4: memref<100x30xbf16, #tpu.memory_space<vmem>>, %arg5: memref<100x1xf32, #tpu.memory_space<vmem>>, %arg6: memref<50x100xbf16, #tpu.memory_space<vmem>>, %arg7: memref<50x1xf32, #tpu.memory_space<vmem>>, %arg8: memref<1x50xbf16, #tpu.memory_space<vmem>>, %arg9: memref<1x1xf32, #tpu.memory_space<vmem>>, %arg10: memref<1x8xf32, #tpu.memory_space<vmem>>) attributes {dimension_semantics = [#tpu.dimension_semantics<parallel>], iteration_bounds = array<i64: 1>, scalar_prefetch = 0 : i64, scratch_operands = 0 : i64, tpu.core_type = #tpu.core_type<tc>, window_params = [{transform_indices = @transform_0, window_bounds = array<i64: 8, 10>}, {pipeline_mode = #tpu.pipeline_mode<synchronous>, transform_indices = @transform_1, window_bounds = array<i64: 30, 10>}, {pipeline_mode = #tpu.pipeline_mode<synchronous>, transform_indices = @transform_2, window_bounds = array<i64: 30, 1>}, {pipeline_mode = #tpu.pipeline_mode<synchronous>, transform_indices = @transform_3, window_bounds = array<i64: 100, 30>}, {pipeline_mode = #tpu.pipeline_mode<synchronous>, transform_indices = @transform_4, window_bounds = array<i64: 100, 1>}, {pipeline_mode = #tpu.pipeline_mode<synchronous>, transform_indices = @transform_5, window_bounds = array<i64: 50, 100>}, {pipeline_mode = #tpu.pipeline_mode<synchronous>, transform_indices = @transform_6, window_bounds = array<i64: 50, 1>}, {pipeline_mode = #tpu.pipeline_mode<synchronous>, transform_indices = @transform_7, window_bounds = array<i64: 1, 50>}, {pipeline_mode = #tpu.pipeline_mode<synchronous>, transform_indices = @transform_8, window_bounds = array<i64: 1, 1>}, {transform_indices = @transform_9, window_bounds = array<i64: 1, 8>}]} {
    %c0 = arith.constant 0 : index
    %c0_0 = arith.constant 0 : index
    %0 = vector.load %arg1[%c0, %c0_0] : memref<8x10xf32, #tpu.memory_space<vmem>>, vector<8x10xf32>
    %1 = arith.truncf %0 : vector<8x10xf32> to vector<8x10xbf16>
    %c0_1 = arith.constant 0 : index
    %c0_2 = arith.constant 0 : index
    %2 = vector.load %arg2[%c0_1, %c0_2] : memref<30x10xbf16, #tpu.memory_space<vmem>>, vector<30x10xbf16>
    %cst = arith.constant dense<0.000000e+00> : vector<30x8xf32>
    %3 = tpu.matmul %2, %1, %cst {dimension_numbers = #tpu.dot_dimension_numbers<[1], [1], [0], [0], [0, 0, 1, 0], [], []>} : vector<30x10xbf16>, vector<8x10xbf16>, vector<30x8xf32> -> vector<30x8xf32>
    %c0_3 = arith.constant 0 : index
    %c0_4 = arith.constant 0 : index
    %4 = vector.load %arg3[%c0_3, %c0_4] : memref<30x1xf32, #tpu.memory_space<vmem>>, vector<30x1xf32>
    %5 = vector.broadcast %4 : vector<30x1xf32> to vector<30x8xf32>
    %6 = arith.addf %3, %5 : vector<30x8xf32>
    %cst_5 = arith.constant 0.000000e+00 : f32
    %7 = vector.broadcast %cst_5 : f32 to vector<30x8xf32>
    %8 = arith.maximumf %6, %7 : vector<30x8xf32>
    %c0_6 = arith.constant 0 : index
    %c0_7 = arith.constant 0 : index
    %9 = vector.load %arg4[%c0_6, %c0_7] : memref<100x30xbf16, #tpu.memory_space<vmem>>, vector<100x30xbf16>
    %10 = arith.truncf %8 : vector<30x8xf32> to vector<30x8xbf16>
    %cst_8 = arith.constant dense<0.000000e+00> : vector<100x8xf32>
    %11 = tpu.matmul %9, %10, %cst_8 {dimension_numbers = #tpu.dot_dimension_numbers<[1], [0], [0], [1], [0, 0, 1, 1], [], []>} : vector<100x30xbf16>, vector<30x8xbf16>, vector<100x8xf32> -> vector<100x8xf32>
    %c0_9 = arith.constant 0 : index
    %c0_10 = arith.constant 0 : index
    %12 = vector.load %arg5[%c0_9, %c0_10] : memref<100x1xf32, #tpu.memory_space<vmem>>, vector<100x1xf32>
    %13 = vector.broadcast %12 : vector<100x1xf32> to vector<100x8xf32>
    %14 = arith.addf %11, %13 : vector<100x8xf32>
    %cst_11 = arith.constant 0.000000e+00 : f32
    %15 = vector.broadcast %cst_11 : f32 to vector<100x8xf32>
    %16 = arith.maximumf %14, %15 : vector<100x8xf32>
    %c0_12 = arith.constant 0 : index
    %c0_13 = arith.constant 0 : index
    %17 = vector.load %arg6[%c0_12, %c0_13] : memref<50x100xbf16, #tpu.memory_space<vmem>>, vector<50x100xbf16>
    %18 = arith.truncf %16 : vector<100x8xf32> to vector<100x8xbf16>
    %cst_14 = arith.constant dense<0.000000e+00> : vector<50x8xf32>
    %19 = tpu.matmul %17, %18, %cst_14 {dimension_numbers = #tpu.dot_dimension_numbers<[1], [0], [0], [1], [0, 0, 1, 1], [], []>} : vector<50x100xbf16>, vector<100x8xbf16>, vector<50x8xf32> -> vector<50x8xf32>
    %c0_15 = arith.constant 0 : index
    %c0_16 = arith.constant 0 : index
    %20 = vector.load %arg7[%c0_15, %c0_16] : memref<50x1xf32, #tpu.memory_space<vmem>>, vector<50x1xf32>
    %21 = vector.broadcast %20 : vector<50x1xf32> to vector<50x8xf32>
    %22 = arith.addf %19, %21 : vector<50x8xf32>
    %cst_17 = arith.constant 0.000000e+00 : f32
    %23 = vector.broadcast %cst_17 : f32 to vector<50x8xf32>
    %24 = arith.maximumf %22, %23 : vector<50x8xf32>
    %c0_18 = arith.constant 0 : index
    %c0_19 = arith.constant 0 : index
    %25 = vector.load %arg8[%c0_18, %c0_19] : memref<1x50xbf16, #tpu.memory_space<vmem>>, vector<1x50xbf16>
    %26 = arith.truncf %24 : vector<50x8xf32> to vector<50x8xbf16>
    %cst_20 = arith.constant dense<0.000000e+00> : vector<1x8xf32>
    %27 = tpu.matmul %25, %26, %cst_20 {dimension_numbers = #tpu.dot_dimension_numbers<[1], [0], [0], [1], [0, 0, 1, 1], [], []>} : vector<1x50xbf16>, vector<50x8xbf16>, vector<1x8xf32> -> vector<1x8xf32>
    %c0_21 = arith.constant 0 : index
    %c0_22 = arith.constant 0 : index
    %28 = vector.load %arg9[%c0_21, %c0_22] : memref<1x1xf32, #tpu.memory_space<vmem>>, vector<1x1xf32>
    %29 = vector.broadcast %28 : vector<1x1xf32> to vector<1x8xf32>
    %30 = arith.addf %27, %29 : vector<1x8xf32>
    %c0_23 = arith.constant 0 : index
    %c0_24 = arith.constant 0 : index
    %31 = vector.load %arg10[%c0_23, %c0_24] : memref<1x8xf32, #tpu.memory_space<vmem>>, vector<1x8xf32>
    tpu.vector_store %arg10[%c0_23, %c0_24], %30 {strides = array<i32>} : memref<1x8xf32, #tpu.memory_space<vmem>>, vector<1x8xf32>,
    return
  }
  func.func @transform_0(%arg0: i32) -> (i32, i32) {
    %c0_i32 = arith.constant 0 : i32
    %c0_i32_0 = arith.constant 0 : i32
    return %arg0, %c0_i32 : i32, i32
  }
  func.func @transform_1(%arg0: i32) -> (i32, i32) {
    %c0_i32 = arith.constant 0 : i32
    %c0_i32_0 = arith.constant 0 : i32
    %c0_i32_1 = arith.constant 0 : i32
    return %c0_i32, %c0_i32_0 : i32, i32
  }
  func.func @transform_2(%arg0: i32) -> (i32, i32) {
    %c0_i32 = arith.constant 0 : i32
    %c0_i32_0 = arith.constant 0 : i32
    %c0_i32_1 = arith.constant 0 : i32
    return %c0_i32, %c0_i32_0 : i32, i32
  }
  func.func @transform_3(%arg0: i32) -> (i32, i32) {
    %c0_i32 = arith.constant 0 : i32
    %c0_i32_0 = arith.constant 0 : i32
    %c0_i32_1 = arith.constant 0 : i32
    return %c0_i32, %c0_i32_0 : i32, i32
  }
  func.func @transform_4(%arg0: i32) -> (i32, i32) {
    %c0_i32 = arith.constant 0 : i32
    %c0_i32_0 = arith.constant 0 : i32
    %c0_i32_1 = arith.constant 0 : i32
    return %c0_i32, %c0_i32_0 : i32, i32
  }
  func.func @transform_5(%arg0: i32) -> (i32, i32) {
    %c0_i32 = arith.constant 0 : i32
    %c0_i32_0 = arith.constant 0 : i32
    %c0_i32_1 = arith.constant 0 : i32
    return %c0_i32, %c0_i32_0 : i32, i32
  }
  func.func @transform_6(%arg0: i32) -> (i32, i32) {
    %c0_i32 = arith.constant 0 : i32
    %c0_i32_0 = arith.constant 0 : i32
    %c0_i32_1 = arith.constant 0 : i32
    return %c0_i32, %c0_i32_0 : i32, i32
  }
  func.func @transform_7(%arg0: i32) -> (i32, i32) {
    %c0_i32 = arith.constant 0 : i32
    %c0_i32_0 = arith.constant 0 : i32
    %c0_i32_1 = arith.constant 0 : i32
    return %c0_i32, %c0_i32_0 : i32, i32
  }
  func.func @transform_8(%arg0: i32) -> (i32, i32) {
    %c0_i32 = arith.constant 0 : i32
    %c0_i32_0 = arith.constant 0 : i32
    %c0_i32_1 = arith.constant 0 : i32
    return %c0_i32, %c0_i32_0 : i32, i32
  }
  func.func @transform_9(%arg0: i32) -> (i32, i32) {
    %c0_i32 = arith.constant 0 : i32
    %c0_i32_0 = arith.constant 0 : i32
    return %c0_i32, %arg0 : i32, i32
  }
}

</mosaic_0001>

<bundles_post_ra>
// kernel: tpu_custom_call.1
= control target key start
LH: loop header
LB: loop body
LE: loop exit
PB: predicated region body
PF: predicated region fallthrough
CT: control target
= control target key end

     0   :  { %s794_s0 = inlined_call_operand.vmem [shape: f32[8,10], index: 0, kind: input, shape index: {}]   ;;  %s795_s1 = inlined_call_operand.vmem [shape: bf16[30,10], index: 1, kind: input, shape index: {}]   ;;  %s796_s2 = inlined_call_operand.vmem [shape: f32[30,1], index: 2, kind: input, shape index: {}]   ;;  %s797_s3 = inlined_call_operand.vmem [shape: bf16[100,30], index: 3, kind: input, shape index: {}]   ;;  %s798_s4 = inlined_call_operand.vmem [shape: f32[100,1], index: 4, kind: input, shape index: {}]   ;;  %s799_s5 = inlined_call_operand.vmem [shape: bf16[50,100], index: 5, kind: input, shape index: {}]   ;;  %s800_s6 = inlined_call_operand.vmem [shape: f32[50,1], index: 6, kind: input, shape index: {}]   ;;  %s801_s7 = inlined_call_operand.vmem [shape: bf16[1,50], index: 7, kind: input, shape index: {}]   ;;  %s802_s8 = inlined_call_operand.<no memory space> [shape: f32[1,1], index: 8, kind: input, shape index: {}]   ;;  %s803_s9 = inlined_call_operand.hbm [shape: f32[1,8], index: 9, kind: output, shape index: {}]  }
   0x1   :  { %v14_v0 = vstv %s802_s8 }
   0x2   :  { %15 = vst [vmem:[#allocation2] sm:$0x1] %v14_v0 }
   0x3   :  { %v44_v1 = vld [vmem:[%s796_s2 + $0x10] sm:$0xff]  ;;  %v42_v2 = vld [vmem:[%s796_s2] sm:$0xff]  ;;  %vm76_vm0 = vcmask 80896   ;;  %v603_v4 = vmov 0  }
   0x4   :  { %v36_v3 = vld [vmem:[%s794_s0] sm:$0xff]  ;;  %575 = vset.pattern.permute.xlu1 %v603_v4  ;;  %574 = vset.pattern.permute.xlu0 %v603_v4 }
   0x5   :  { %v37_v5 = vpack.c.bf16 %v36_v3, %v36_v3  ;;  %58 = vperm.xlu0 %574, %v44_v1   ;;  %48 = vperm.xlu1 %575, %v42_v2  }
   0x6   :  { %576 = vset.pattern.permute.xlu2 %v603_v4 }
   0x7   :  { %v84_v6 = vsel %vm76_vm0, %v37_v5, 0 }
   0x8   :  { %93 = vmatpush.bf16.xpose.msra.mxu0 %v84_v6 }
   0x9   :  { %16 = vsyncpa [#allocation4], 0  ;;  %v45_v7 = vld [vmem:[%s796_s2 + $0x18] sm:$0x3f]  ;;  %v43_v8 = vld [vmem:[%s796_s2 + $0x8] sm:$0xff]  ;;  %vm257_vm1 = vcmask 1046528  }
   0xa   :  { %v552_v9 = vld [vmem:[%s795_s1] sm:$0xff]  ;;  %v135_v10 = vld [vmem:[%s798_s4 + $0x58] sm:$0xff]  ;;  %v500_v12 = vld [vmem:[%s795_s1 + $0x8] sm:$0xf]  ;;  %vm235_vm2 = vcmask 244736   ;;  %vm404_vm3 = vcmask 1041408  }
   0xb   :  { %v132_v11 = vld [vmem:[%s798_s4 + $0x40] sm:$0xff]  ;;  %v553_v13 = vld [vmem:[%s795_s1 + $0x8] sm:$0x70]  ;;  %v130_v14 = vld [vmem:[%s798_s4 + $0x30] sm:$0xff]  ;;  %vm391_vm4 = vcmask 818176   ;;  %vm459_vm5 = vcmask 1040384  }
   0xc   :  { %v131_v15 = vld [vmem:[%s798_s4 + $0x38] sm:$0xff]  ;;  %v501_v16 = vor.u32 %v553_v13, %v500_v12  ;;  %v129_v17 = vld [vmem:[%s798_s4 + $0x28] sm:$0xff]  ;;  %v126_v18 = vld [vmem:[%s798_s4 + $0x10] sm:$0xff]  ;;  %vm455_vm6 = vcmask 408576   ;;  %s604_s13 = smov [#allocation3]   ;;  %s485_s16 = sshll.u32 %s803_s9, 4  ;;  %s486_s16 = int_to_ptr.hbm [resolvable:$true] %s485_s16 }
   0xd   :  { %63 = vperm.xlu0 %574, %v45_v7   ;;  %53 = vperm.xlu1 %575, %v43_v8   ;;  %v124_v19 = vld [vmem:[%s798_s4] sm:$0xff]  ;;  %v125_v20 = vld [vmem:[%s798_s4 + $0x8] sm:$0xff]  ;;  %v334_v23 = vld [vmem:[%s800_s6 + $0x18] sm:$0xff]  ;;  %s483_s14 = sshll.u32 %s604_s13, 4  ;;  %vm476_vm7 = vcmask 57344   ;;  %s484_s14 = int_to_ptr.vmem [resolvable:$true] %s483_s14 }
   0xe   :  { %v335_v21 = vld [vmem:[%s800_s6 + $0x20] sm:$0xff]  ;;  %v336_v22 = vld [vmem:[%s800_s6 + $0x28] sm:$0xff]  ;;  %v134_v33 = vld [vmem:[%s798_s4 + $0x50] sm:$0xff] }
   0xf   :  { %502 = vmatmul.msk.bf16.vlgmr.msra.gmra.mxu0 %vm76_vm0, %v552_v9  ;;  %v331_v24 = vld [vmem:[%s800_s6] sm:$0xff]  ;;  %v133_v44 = vld [vmem:[%s798_s4 + $0x48] sm:$0xff]  ;;  %v127_v51 = vld [vmem:[%s798_s4 + $0x18] sm:$0xff] }
  0x10   :  { %v448_v25 = vld [vmem:[#allocation2] sm:$0x1]  ;;  %v555_v52 = vld [vmem:[%s797_s3 + $0x8] sm:$0xff]  ;;  %v337_v54 = vld [vmem:[%s800_s6 + $0x30] sm:$0x3] }
  0x11   :  { %v136_v28 = vld [vmem:[%s798_s4 + $0x60] sm:$0xf]  ;;  %v559_v53 = vld [vmem:[%s797_s3 + $0x28] sm:$0xff]  ;;  %v121_v55 = vld [vmem:[%s797_s3 + $0x30] sm:$0x3] }
  0x12   :  { %199 = vperm.xlu2 %576, %v136_v28   ;;  %v554_v48 = vld [vmem:[%s797_s3] sm:$0xff]  ;;  %v333_v56 = vld [vmem:[%s800_s6 + $0x10] sm:$0xff]  ;;  %v227_v57 = vunpack.c.l.b16 %v121_v55  ;;  %v332_v60 = vld [vmem:[%s800_s6 + $0x8] sm:$0xff] }
  0x13   :  { %v558_v49 = vld [vmem:[%s797_s3 + $0x20] sm:$0xff]  ;;  %v556_v58 = vld [vmem:[%s797_s3 + $0x10] sm:$0xff]  ;;  %v557_v61 = vld [vmem:[%s797_s3 + $0x18] sm:$0xff] }
  0x14   :  { %v128_v50 = vld [vmem:[%s798_s4 + $0x20] sm:$0xff]  ;;  %v234_v59 = vpack.c.b16 %v227_v57, %v227_v57 }
  0x15   :  { %194 = vperm.xlu0 %574, %v135_v10   ;;  %179 = vperm.xlu1 %575, %v132_v11  }
  0x1a   :  { %189 = vperm.xlu2 %576, %v134_v33  }
  0x1d   :  { %169 = vperm.xlu0 %574, %v130_v14   ;;  %174 = vperm.xlu1 %575, %v131_v15  }
  0x1f   :  { %503 = vmatmul.msk.bf16.gmra.mxu0 %vm76_vm0, %v501_v16 }
  0x22   :  { %184 = vperm.xlu2 %576, %v133_v44  }
  0x25   :  { %164 = vperm.xlu0 %574, %v129_v17   ;;  %149 = vperm.xlu1 %575, %v126_v18  }
  0x2a   :  { %159 = vperm.xlu2 %576, %v128_v50  }
  0x2d   :  { %139 = vperm.xlu0 %574, %v124_v19   ;;  %144 = vperm.xlu1 %575, %v125_v20  }
  0x32   :  { %154 = vperm.xlu2 %576, %v127_v51  }
  0x35   :  { %360 = vperm.xlu0 %574, %v335_v21   ;;  %365 = vperm.xlu1 %575, %v336_v22  }
  0x3a   :  { %370 = vperm.xlu2 %576, %v337_v54  }
  0x3d   :  { %355 = vperm.xlu0 %574, %v334_v23   ;;  %340 = vperm.xlu1 %575, %v331_v24  }
  0x42   :  { %350 = vperm.xlu2 %576, %v333_v56  }
  0x45   :  { %451 = vperm.xlu0 %574, %v448_v25  }
  0x4a   :  { %345 = vperm.xlu2 %576, %v332_v60   ;;  %v561_v60 = vld [vmem:[%s799_s5 + $0x8] sm:$0xff] }
  0x6c   :  { %v200_v3 = vpop.permute.xlu2 %199 }
  0x74   :  { %v190_v6 = vpop.permute.xlu2 %189 }
  0x77   :  { %v59_v29 = vpop.permute.xlu0 %58  ;;  %v49_v30 = vpop.permute.xlu1 %48 }
  0x7c   :  { %v185_v13 = vpop.permute.xlu2 %184 }
  0x7f   :  { %v64_v34 = vpop.permute.xlu0 %63  ;;  %v54_v36 = vpop.permute.xlu1 %53 }
  0x87   :  { %v180_v9 = vpop.permute.xlu1 %179  ;;  %v195_v10 = vpop.permute.xlu0 %194 }
  0x8c   :  { %v95_v26 = vpop.f32.mrf.mxu0 }
  0x8d   :  { %v96_v41 = vadd.f32 %v95_v26, %v49_v30  ;;  %v160_v30 = vpop.permute.xlu2 %159 }
  0x8f   :  { %v105_v46 = vmax.f32 %v96_v41, 0.0  ;;  %v175_v19 = vpop.permute.xlu1 %174  ;;  %v170_v23 = vpop.permute.xlu0 %169 }
  0x94   :  { %v97_v27 = vpop.f32.mrf.mxu0 }
  0x95   :  { %v98_v38 = vadd.f32 %v97_v27, %v54_v36 }
  0x97   :  { %v106_v43 = vmax.f32 %v98_v38, 0.0  ;;  %v150_v33 = vpop.permute.xlu1 %149 }
  0x99   :  { %v122_v47 = vpack.c.bf16 %v106_v43, %v105_v46 }
  0x9c   :  { %v100_v31 = vpop.f32.mrf.mxu0 }
  0x9d   :  { %v101_v32 = vadd.f32 %v100_v31, %v59_v29 }
  0x9f   :  { %v107_v39 = vmax.f32 %v101_v32, 0.0 }
  0xa4   :  { %v102_v35 = vpop.f32.mrf.mxu0 }
  0xa5   :  { %v103_v37 = vadd.f32 %v102_v35, %v64_v34  ;;  %v165_v35 = vpop.permute.xlu0 %164 }
  0xa7   :  { %v108_v40 = vmax.f32 %v103_v37, 0.0 }
  0xa9   :  { %v123_v42 = vpack.c.bf16 %v108_v40, %v107_v39 }
  0xab   :  { %v259_v45 = vsel %vm257_vm1, %v123_v42, 0  ;;  %v155_v42 = vpop.permute.xlu2 %154 }
  0xac   :  { %267 = vmatpush.bf16.msra.mxu1 %v259_v45  ;;  %563 = vmatpush.bf16.msra.mxu3 %v259_v45 }
  0xb0   :  { %268 = vmatpush.bf16.msra.mxu1 %v122_v47  ;;  %564 = vmatpush.bf16.msra.mxu3 %v122_v47 }
  0xb3   :  { %528 = vmatmul.msk.bf16.vlgmr.msra.gmra.mxu1 %vm235_vm2, %v554_v48  ;;  %532 = vmatmul.msk.bf16.vlgmr.msra.gmra.mxu3 %vm235_vm2, %v558_v49  ;;  %v145_v48 = vpop.permute.xlu1 %144 }
  0xc3   :  { %529 = vmatmul.msk.bf16.gmra.mxu1 %vm235_vm2, %v555_v52  ;;  %533 = vmatmul.msk.bf16.gmra.mxu3 %vm235_vm2, %v559_v53  ;;  %v140_v52 = vpop.permute.xlu0 %139 }
  0xd3   :  { %530 = vmatmul.msk.bf16.gmra.mxu1 %vm235_vm2, %v556_v58  ;;  %534 = vmatmul.msk.bf16.gmra.mxu3 %vm235_vm2, %v234_v59  ;;  %v560_v59 = vld [vmem:[%s799_s5] sm:$0xff] }
  0xe3   :  { %531 = vmatmul.msk.bf16.gmra.mxu1 %vm235_vm2, %v557_v61  ;;  %v562_v61 = vld [vmem:[%s799_s5 + $0x10] sm:$0xff] }
 0x130   :  { %v773_v62 = vpop.f32.mrf.mxu1 }
 0x131   :  { %v271_v53 = vadd.f32 %v773_v62, %v140_v52  ;;  %v323_v62 = vld [vmem:[%s799_s5 + $0x18] sm:$0x1] }
 0x133   :  { %v304_v57 = vmax.f32 %v271_v53, 0.0 }
 0x136   :  { %v290_v63 = vpop.f32.mrf.mxu3 }
 0x137   :  { %v291_v24 = vadd.f32 %v290_v63, %v180_v9  ;;  %v386_v63 = vunpack.c.l.b16 %v323_v62 }
 0x138   :  { %v272_v0 = vpop.f32.mrf.mxu1 }
 0x139   :  { %v312_v31 = vmax.f32 %v291_v24, 0.0  ;;  %v273_v49 = vadd.f32 %v272_v0, %v145_v48  ;;  %v390_v0 = vpack.c.b16 %v386_v63, %v386_v63 }
 0x13b   :  { %v305_v55 = vmax.f32 %v273_v49, 0.0 }
 0x13d   :  { %v324_v58 = vpack.c.bf16 %v305_v55, %v304_v57 }
 0x13e   :  { %v292_v1 = vpop.f32.mrf.mxu3 }
 0x13f   :  { %v293_v20 = vadd.f32 %v292_v1, %v185_v13 }
 0x140   :  { %v275_v2 = vpop.f32.mrf.mxu1 }
 0x141   :  { %v313_v27 = vmax.f32 %v293_v20, 0.0  ;;  %v276_v46 = vadd.f32 %v275_v2, %v150_v33 }
 0x143   :  { %v328_v32 = vpack.c.bf16 %v313_v27, %v312_v31  ;;  %v306_v54 = vmax.f32 %v276_v46, 0.0 }
 0x146   :  { %v295_v4 = vpop.f32.mrf.mxu3 }
 0x147   :  { %v296_v17 = vadd.f32 %v295_v4, %v190_v6  ;;  %v371_v4 = vpop.permute.xlu2 %370  ;;  %v361_v6 = vpop.permute.xlu0 %360 }
 0x148   :  { %v277_v5 = vpop.f32.mrf.mxu1 }
 0x149   :  { %v314_v25 = vmax.f32 %v296_v17, 0.0  ;;  %v278_v43 = vadd.f32 %v277_v5, %v155_v42 }
 0x14b   :  { %v307_v50 = vmax.f32 %v278_v43, 0.0 }
 0x14d   :  { %v325_v56 = vpack.c.bf16 %v307_v50, %v306_v54 }
 0x14e   :  { %v297_v7 = vpop.f32.mrf.mxu3 }
 0x14f   :  { %v298_v14 = vadd.f32 %v297_v7, %v195_v10  ;;  %v366_v10 = vpop.permute.xlu1 %365 }
 0x150   :  { %v280_v8 = vpop.f32.mrf.mxu1 }
 0x151   :  { %v315_v21 = vmax.f32 %v298_v14, 0.0  ;;  %v281_v39 = vadd.f32 %v280_v8, %v160_v30  ;;  %v351_v8 = vpop.permute.xlu2 %350 }
 0x153   :  { %v329_v29 = vpack.c.bf16 %v315_v21, %v314_v25  ;;  %v308_v47 = vmax.f32 %v281_v39, 0.0 }
 0x156   :  { %v300_v11 = vpop.f32.mrf.mxu3 }
 0x157   :  { %v301_v12 = vadd.f32 %v300_v11, %v200_v3 }
 0x158   :  { %v282_v15 = vpop.f32.mrf.mxu1 }
 0x159   :  { %v316_v16 = vmax.f32 %v301_v12, 0.0  ;;  %v283_v37 = vadd.f32 %v282_v15, %v165_v35  ;;  %v356_v15 = vpop.permute.xlu0 %355  ;;  %v346_v24 = vpop.permute.xlu2 %345  ;;  %v443_v35 = vld [vmem:[%s801_s7] sm:$0x1] }
 0x15b   :  { %v330_v18 = vpack.c.bf16 %v316_v16, %v316_v16  ;;  %v309_v44 = vmax.f32 %v283_v37, 0.0 }
 0x15d   :  { %v406_v22 = vsel %vm404_vm3, %v330_v18, 0  ;;  %v326_v51 = vpack.c.bf16 %v309_v44, %v308_v47 }
 0x15e   :  { %v302_v26 = vpop.f32.mrf.mxu3  ;;  %409 = vmatpush.bf16.msrb.mxu0 %v406_v22  ;;  %565 = vmatpush.bf16.msra.mxu2 %v406_v22 }
 0x160   :  { %v285_v28 = vpop.f32.mrf.mxu1 }
 0x161   :  { %v286_v34 = vadd.f32 %v285_v28, %v170_v23  ;;  %v341_v28 = vpop.permute.xlu1 %340 }
 0x162   :  { %410 = vmatpush.bf16.msrb.mxu0 %v329_v29  ;;  %566 = vmatpush.bf16.msra.mxu2 %v329_v29 }
 0x163   :  { %v310_v40 = vmax.f32 %v286_v34, 0.0 }
 0x166   :  { %411 = vmatpush.bf16.msrb.mxu0 %v328_v32  ;;  %567 = vmatpush.bf16.msra.mxu2 %v328_v32 }
 0x168   :  { %v287_v36 = vpop.f32.mrf.mxu1 }
 0x169   :  { %v288_v38 = vadd.f32 %v287_v36, %v175_v19  ;;  %v452_v36 = vpop.permute.xlu0 %451 }
 0x16a   :  { %v454_v37 = vperm.slane %v452_v36, 0 }
 0x16b   :  { %v311_v41 = vmax.f32 %v288_v38, 0.0 }
 0x16d   :  { %v327_v45 = vpack.c.bf16 %v311_v41, %v310_v40 }
 0x16f   :  { %412 = vmatpush.bf16.msrb.mxu0 %v327_v45  ;;  %568 = vmatpush.bf16.msra.mxu2 %v327_v45 }
 0x173   :  { %413 = vmatpush.bf16.msrb.mxu0 %v326_v51  ;;  %569 = vmatpush.bf16.msra.mxu2 %v326_v51 }
 0x177   :  { %414 = vmatpush.bf16.msrb.mxu0 %v325_v56  ;;  %570 = vmatpush.bf16.msra.mxu2 %v325_v56 }
 0x17b   :  { %415 = vmatpush.bf16.msrb.mxu0 %v324_v58  ;;  %571 = vmatpush.bf16.msra.mxu2 %v324_v58 }
 0x17e   :  { %547 = vmatmul.msk.bf16.vlgmr.msrb.gmra.mxu0 %vm391_vm4, %v560_v59  ;;  %548 = vmatmul.msk.bf16.vlgmr.msra.gmra.mxu2 %vm391_vm4, %v561_v60 }
 0x18e   :  { %549 = vmatmul.msk.bf16.gmra.mxu2 %vm391_vm4, %v562_v61 }
 0x19e   :  { %550 = vmatmul.msk.bf16.gmra.mxu2 %vm391_vm4, %v390_v0 }
 0x1fb   :  { %v417_v7 = vpop.f32.mrf.mxu0 }
 0x1fc   :  { %v418_v29 = vadd.f32 %v417_v7, %v341_v28 }
 0x1fe   :  { %v436_v33 = vmax.f32 %v418_v29, 0.0 }
 0x201   :  { %v422_v1 = vpop.f32.mrf.mxu2 }
 0x202   :  { %v423_v21 = vadd.f32 %v422_v1, %v351_v8 }
 0x203   :  { %v419_v19 = vpop.f32.mrf.mxu0 }
 0x204   :  { %v420_v25 = vadd.f32 %v419_v19, %v346_v24  ;;  %v438_v30 = vmax.f32 %v423_v21, 0.0 }
 0x206   :  { %v437_v31 = vmax.f32 %v420_v25, 0.0 }
 0x208   :  { %v444_v34 = vpack.c.bf16 %v437_v31, %v436_v33 }
 0x209   :  { %v424_v2 = vpop.f32.mrf.mxu2 }
 0x20a   :  { %v425_v17 = vadd.f32 %v424_v2, %v356_v15 }
 0x20c   :  { %v439_v26 = vmax.f32 %v425_v17, 0.0 }
 0x20e   :  { %v445_v32 = vpack.c.bf16 %v439_v26, %v438_v30 }
 0x211   :  { %v427_v3 = vpop.f32.mrf.mxu2 }
 0x212   :  { %v428_v14 = vadd.f32 %v427_v3, %v361_v6 }
 0x214   :  { %v440_v22 = vmax.f32 %v428_v14, 0.0 }
 0x219   :  { %v429_v5 = vpop.f32.mrf.mxu2 }
 0x21a   :  { %v430_v12 = vadd.f32 %v429_v5, %v366_v10 }
 0x21c   :  { %v441_v18 = vmax.f32 %v430_v12, 0.0 }
 0x21e   :  { %v446_v27 = vpack.c.bf16 %v441_v18, %v440_v22 }
 0x221   :  { %v432_v9 = vpop.f32.mrf.mxu2 }
 0x222   :  { %v433_v11 = vadd.f32 %v432_v9, %v371_v4 }
 0x224   :  { %v442_v13 = vmax.f32 %v433_v11, 0.0 }
 0x226   :  { %v447_v16 = vpack.c.bf16 %v442_v13, %v442_v13 }
 0x228   :  { %v461_v20 = vsel %vm459_vm5, %v447_v16, 0 }
 0x229   :  { %v434_v23 = vpop.f32.mrf.mxu2  ;;  %467 = vmatpush.bf16.msrb.mxu3 %v461_v20 }
 0x22d   :  { %468 = vmatpush.bf16.msrb.mxu3 %v446_v27 }
 0x231   :  { %469 = vmatpush.bf16.msrb.mxu3 %v445_v32 }
 0x235   :  { %470 = vmatpush.bf16.msrb.mxu3 %v444_v34 }
 0x238   :  { %551 = vmatmul.msk.bf16.vlgmr.msrb.gmra.mxu3 %vm455_vm6, %v443_v35 }
 0x2bb   :  { %v472_v38 = vpop.f32.mrf.mxu3 }
 0x2bc   :  { %v473_v39 = vadd.f32 %v472_v38, %v454_v37 }
 0x2be   :  { %477 = vst.msk [vmem:[#allocation3] sm:$0x1] %vm476_vm7, %v473_v39 }
 0x2bf   :  { %488 = dma.vmem_to_hbm [thread:$0]  %s484_s14, 16, %s486_s16, [#allocation4]  }
 0x2c3   :  { %v474_v40 = vpop.f32.mrf.mxu3 }
 0x2c4   :  { %601 = dma.done.wait [#allocation4], 16  }
 0x2c5   :  { %602 = vsyncadd [#allocation4], 4294967280 }
 0x2c6   :  { %493 = vsyncpa [#allocation4], 1 }

</bundles_post_ra>
